<compile_context>
chip_gen: v7x
topology: tpu7x:2x2x1
jax: 0.10.0
libtpu: 0.0.40
codegen_flags: <defaults>
</compile_context>

<pallas_src>
import functools

import jax
import jax.numpy as jnp
from jax.experimental import pallas as pl
from jax.experimental.pallas import tpu as pltpu


# ----------------------------------------------------------------------------
# Fused whole-network kernel (one batch sample per grid step)
# ----------------------------------------------------------------------------
def _fused_net_kernel(x_ref, mask_ref, wc_ref, bc_ref, wbig_ref, dmask_ref,
                      g_ref, bl_ref, o_ref, slab_ref, *, H, W, Cin):
    """conv3x3(pad=1)+bias+ReLU -> maxpool2x2 -> flatten -> linear.

    x_ref    : (1, Cin, H*W)        one sample, lane = h*W + w
    mask_ref : (9*Cin, H*W)         halo/tap-validity mask (precomputed)
    wc_ref   : (Cout, 9*Cin)        conv weight, column = (kh*3+kw)*Cin + ci
    bc_ref   : (Cout, 1)            conv bias
    wbig_ref : (H*W, ncls*Cout)     head weight scattered on even-(h,w) lanes
    dmask_ref: (Cout, ncls*Cout)    co==co2 diagonal-extraction mask
    g_ref    : (ncls*Cout, ncls)    Cout-group summation matrix
    bl_ref   : (1, ncls)            linear bias
    o_ref    : (1, 1, ncls)
    slab_ref : (9*Cin, H*W)         VMEM scratch for the stacked im2col slab
    """
    HW = H * W
    xn = x_ref[0]                                   # (Cin, HW)

    # ---- im2col: stack the 9 lane-rolled copies of xn on the sublane axis.
    for s in range(9):
        kh, kw = s // 3, s % 3
        d = (kh - 1) * W + (kw - 1)
        win = xn if d == 0 else pltpu.roll(xn, shift=(-d) % HW, axis=1)
        slab_ref[s * Cin:(s + 1) * Cin, :] = win

    # Halo taps (and roll wraparound) zeroed with ONE precomputed mask multiply.
    slab = slab_ref[...] * mask_ref[...]            # (9*Cin, HW)

    # ---- conv3x3 (SAME) + bias + ReLU as one MXU matmul, contraction 9*Cin.
    conv = jnp.dot(wc_ref[...], slab, preferred_element_type=jnp.float32)
    act = jnp.maximum(conv + bc_ref[...], 0.0)      # (Cout, HW)

    # ---- 2x2 stride-2 max pool via XLU rolls (no scratch round trip).  The
    # window max lands on the even-(h, w) lanes; wraparound garbage only hits
    # odd / last-row lanes, which the zero-scattered head weight ignores.
    pooled = jnp.maximum(
        jnp.maximum(act, pltpu.roll(act, shift=(-1) % HW, axis=1)),
        jnp.maximum(pltpu.roll(act, shift=(-W) % HW, axis=1),
                    pltpu.roll(act, shift=(-(W + 1)) % HW, axis=1)))

    # ---- flatten + linear, one main matmul:
    #   R[co, c*Cout+co2] = sum_hw pooled[co,hw] * wl_scat[c,co2,hw]
    # keep the co2==co diagonal, reduce over co (sublanes), then collapse the
    # Cout lane-groups with the tiny constant matrix G.
    r = jnp.dot(pooled, wbig_ref[...], preferred_element_type=jnp.float32)
    s80 = jnp.sum(r * dmask_ref[...], axis=0, keepdims=True)    # (1, ncls*Cout)
    logits = jnp.dot(s80, g_ref[...], preferred_element_type=jnp.float32) + bl_ref[...]
    o_ref[0] = logits.astype(o_ref.dtype)


def _fused_call(xflat, mask36, wc_mat, bc2, wbig, dmask, g, bl2, *, H, W):
    N, Cin, HW = xflat.shape
    Cout = wc_mat.shape[0]
    ncls = bl2.shape[1]
    kern = functools.partial(_fused_net_kernel, H=H, W=W, Cin=Cin)
    out = pl.pallas_call(
        kern,
        out_shape=jax.ShapeDtypeStruct((N, 1, ncls), jnp.float32),
        grid=(N,),
        in_specs=[
            pl.BlockSpec((1, Cin, HW), lambda n: (n, 0, 0)),        # x (per sample)
            pl.BlockSpec((9 * Cin, HW), lambda n: (0, 0)),          # halo mask
            pl.BlockSpec((Cout, 9 * Cin), lambda n: (0, 0)),        # conv weight
            pl.BlockSpec((Cout, 1), lambda n: (0, 0)),              # conv bias
            pl.BlockSpec((HW, ncls * Cout), lambda n: (0, 0)),      # head weight
            pl.BlockSpec((Cout, ncls * Cout), lambda n: (0, 0)),    # diag mask
            pl.BlockSpec((ncls * Cout, ncls), lambda n: (0, 0)),    # group-sum G
            pl.BlockSpec((1, ncls), lambda n: (0, 0)),              # head bias
        ],
        out_specs=pl.BlockSpec((1, 1, ncls), lambda n: (n, 0, 0)),
        scratch_shapes=[pltpu.VMEM((9 * Cin, HW), jnp.float32)],
        compiler_params=pltpu.CompilerParams(
            dimension_semantics=("parallel",)),      # v7x: one sample per TC
    )(xflat, mask36, wc_mat, bc2, wbig, dmask, g, bl2)
    return out.reshape(N, ncls)


# ----------------------------------------------------------------------------
# Network builder: all weight re-layouts & constants built ONCE here.
# ----------------------------------------------------------------------------
def make_fused_network(w_conv, b_conv, w_lin, b_lin, *, H, W):
    Cout, Cin, KH, KW = w_conv.shape
    ncls, feat = w_lin.shape
    assert (KH, KW) == (3, 3)
    # pool-on-lanes + zero-scattered head weight relies on even spatial dims.
    assert H % 2 == 0 and W % 2 == 0, "even H, W required"
    Ho, Wo = H // 2, W // 2
    assert feat == Cout * Ho * Wo
    HW = H * W

    # conv weight -> (Cout, 9*Cin), column order (kh, kw, ci) == slab row order.
    wc_mat = jnp.transpose(w_conv, (0, 2, 3, 1)).reshape(Cout, 9 * Cin).astype(jnp.float32)
    bc2 = b_conv.reshape(Cout, 1).astype(jnp.float32)

    # Per-tap halo-validity mask (9, HW), repeated per input channel.
    hh = jnp.arange(HW, dtype=jnp.int32) // W
    ww = jnp.arange(HW, dtype=jnp.int32) % W
    taps = []
    for kh in range(3):
        for kw in range(3):
            dh, dw = kh - 1, kw - 1
            ok = ((hh + dh >= 0) & (hh + dh < H) & (ww + dw >= 0) & (ww + dw < W))
            taps.append(ok.astype(jnp.float32))
    mask36 = jnp.repeat(jnp.stack(taps, axis=0), Cin, axis=0)          # (9*Cin, HW)

    # Head weight scattered onto even-(h, w) lanes (where the pooled max lives),
    # stored lane-dense as (HW, ncls*Cout) so flatten+linear is one matmul.
    wl4 = w_lin.reshape(ncls, Cout, Ho, Wo).astype(jnp.float32)
    wl_scat = jnp.zeros((ncls, Cout, H, W), jnp.float32).at[:, :, ::2, ::2].set(wl4)
    wbig = jnp.transpose(wl_scat.reshape(ncls, Cout, HW), (2, 0, 1)).reshape(HW, ncls * Cout)
    # Diagonal-extraction / Cout-group-sum constants for the head epilogue.
    dmask = jnp.tile(jnp.eye(Cout, dtype=jnp.float32), (1, ncls))       # (Cout, ncls*Cout)
    g = jnp.repeat(jnp.eye(ncls, dtype=jnp.float32), Cout, axis=0)      # (ncls*Cout, ncls)
    bl2 = b_lin.reshape(1, ncls).astype(jnp.float32)

    def forward(x):                                  # x: (N, Cin, H, W)
        N = x.shape[0]
        xflat = x.reshape(N, Cin, HW)                # contiguous merge, free
        return _fused_call(xflat, mask36, wc_mat, bc2, wbig, dmask, g, bl2, H=H, W=W)

    return forward


# ----------------------------------------------------------------------------
# Graph executor mirroring Network.forward / iter_nodes semantics
# ----------------------------------------------------------------------------
class PallasNetwork:
    """JAX/Pallas port of `Network`: executes a node graph sequentially; a node
    without explicit inputs consumes the previous node's output (or arg 0)."""

    def __init__(self, graph):
        self._graph = dict(graph)

    def forward(self, *args):
        keys = list(self._graph.keys())
        outputs = dict(enumerate(args))
        prev = args[0]
        for j, (name, node) in enumerate(self._graph.items()):
            if isinstance(node, tuple):
                fn, inputs = node
            else:
                fn, inputs = node, [0 if j == 0 else keys[j - 1]]
            if name not in outputs:
                prev = outputs[name] = fn(*[outputs[x] for x in inputs])
        return prev

    __call__ = forward


# ----------------------------------------------------------------------------
# Main
# ----------------------------------------------------------------------------
if __name__ == "__main__":
    key = jax.random.PRNGKey(0)
    k_x, k_wc, k_bc, k_wl, k_bl = jax.random.split(key, 5)

    N, Cin, H, W = 2, 4, 16, 16
    Cout, n_classes = 8, 10
    feat = Cout * (H // 2) * (W // 2)               # 8 * 8 * 8 = 512

    # Deterministic synthetic parameters (shapes match the PyTorch layers).
    w_conv = 0.1 * jax.random.normal(k_wc, (Cout, Cin, 3, 3), jnp.float32)
    b_conv = 0.1 * jax.random.normal(k_bc, (Cout,), jnp.float32)
    w_lin = 0.05 * jax.random.normal(k_wl, (n_classes, feat), jnp.float32)
    b_lin = 0.05 * jax.random.normal(k_bl, (n_classes,), jnp.float32)

    # The conv->relu->pool->flatten->linear chain is one fused Pallas kernel;
    # the executor follows Network.forward's default "previous node" wiring.
    net = PallasNetwork({
        "net": make_fused_network(w_conv, b_conv, w_lin, b_lin, H=H, W=W),
    })

    x = jax.random.normal(k_x, (N, Cin, H, W), jnp.float32)

    out = jax.block_until_ready(jax.jit(net.forward)(x))

    # Pure-JAX reference for correctness.
    ref = jax.lax.conv_general_dilated(
        x, w_conv, window_strides=(1, 1), padding="SAME",
        dimension_numbers=("NCHW", "OIHW", "NCHW"),
    ) + b_conv.reshape(1, -1, 1, 1)
    ref = jnp.maximum(ref, 0.0)
    ref = ref.reshape(N, Cout, H // 2, 2, W // 2, 2).max(axis=(3, 5))
    ref = ref.reshape(N, -1) @ w_lin.T + b_lin

    assert out.shape == (N, n_classes) and out.dtype == jnp.float32
    assert jnp.allclose(out, ref, rtol=1e-3, atol=1e-3), float(jnp.abs(out - ref).max())

    print("KERNEL_OK")
</pallas_src>

<mosaic_0001>
module attributes {stable_mosaic.version = 11 : i64} {
  func.func @_fused_net_kernel(%arg0: i32, %arg1: memref<1x4x256xf32, #tpu.memory_space<vmem>>, %arg2: memref<36x256xf32, #tpu.memory_space<vmem>>, %arg3: memref<8x36xf32, #tpu.memory_space<vmem>>, %arg4: memref<8x1xf32, #tpu.memory_space<vmem>>, %arg5: memref<256x80xf32, #tpu.memory_space<vmem>>, %arg6: memref<8x80xf32, #tpu.memory_space<vmem>>, %arg7: memref<80x10xf32, #tpu.memory_space<vmem>>, %arg8: memref<1x10xf32, #tpu.memory_space<vmem>>, %arg9: memref<1x1x10xf32, #tpu.memory_space<vmem>>, %arg10: memref<36x256xf32, #tpu.memory_space<vmem>>) attributes {dimension_semantics = [#tpu.dimension_semantics<parallel>], iteration_bounds = array<i64: 2>, scalar_prefetch = 0 : i64, scratch_operands = 1 : i64, tpu.core_type = #tpu.core_type<tc>, window_params = [{transform_indices = @transform_0, window_bounds = array<i64: 1, 4, 256>}, {pipeline_mode = #tpu.pipeline_mode<synchronous>, transform_indices = @transform_1, window_bounds = array<i64: 36, 256>}, {pipeline_mode = #tpu.pipeline_mode<synchronous>, transform_indices = @transform_2, window_bounds = array<i64: 8, 36>}, {pipeline_mode = #tpu.pipeline_mode<synchronous>, transform_indices = @transform_3, window_bounds = array<i64: 8, 1>}, {pipeline_mode = #tpu.pipeline_mode<synchronous>, transform_indices = @transform_4, window_bounds = array<i64: 256, 80>}, {pipeline_mode = #tpu.pipeline_mode<synchronous>, transform_indices = @transform_5, window_bounds = array<i64: 8, 80>}, {pipeline_mode = #tpu.pipeline_mode<synchronous>, transform_indices = @transform_6, window_bounds = array<i64: 80, 10>}, {pipeline_mode = #tpu.pipeline_mode<synchronous>, transform_indices = @transform_7, window_bounds = array<i64: 1, 10>}, {transform_indices = @transform_8, window_bounds = array<i64: 1, 1, 10>}]} {
    %c0 = arith.constant 0 : index
    %c0_0 = arith.constant 0 : index
    %c0_1 = arith.constant 0 : index
    %0 = vector.load %arg1[%c0, %c0_0, %c0_1] : memref<1x4x256xf32, #tpu.memory_space<vmem>>, vector<1x4x256xf32>
    %1 = vector.shape_cast %0 : vector<1x4x256xf32> to vector<4x256xf32>
    %c17_i32 = arith.constant 17 : i32
    %2 = tpu.dynamic_rotate %1 by %c17_i32 dim 1 : vector<4x256xf32>, i32 -> vector<4x256xf32>
    %c0_2 = arith.constant 0 : index
    %c0_3 = arith.constant 0 : index
    %3 = vector.load %arg10[%c0_2, %c0_3] : memref<36x256xf32, #tpu.memory_space<vmem>>, vector<4x256xf32>
    tpu.vector_store %arg10[%c0_2, %c0_3], %2 {strides = array<i32>} : memref<36x256xf32, #tpu.memory_space<vmem>>, vector<4x256xf32>,
    %c16_i32 = arith.constant 16 : i32
    %4 = tpu.dynamic_rotate %1 by %c16_i32 dim 1 : vector<4x256xf32>, i32 -> vector<4x256xf32>
    %c4 = arith.constant 4 : index
    %c0_4 = arith.constant 0 : index
    %5 = vector.load %arg10[%c4, %c0_4] : memref<36x256xf32, #tpu.memory_space<vmem>>, vector<4x256xf32>
    tpu.vector_store %arg10[%c4, %c0_4], %4 {strides = array<i32>} : memref<36x256xf32, #tpu.memory_space<vmem>>, vector<4x256xf32>,
    %c15_i32 = arith.constant 15 : i32
    %6 = tpu.dynamic_rotate %1 by %c15_i32 dim 1 : vector<4x256xf32>, i32 -> vector<4x256xf32>
    %c8 = arith.constant 8 : index
    %c0_5 = arith.constant 0 : index
    %7 = vector.load %arg10[%c8, %c0_5] : memref<36x256xf32, #tpu.memory_space<vmem>>, vector<4x256xf32>
    tpu.vector_store %arg10[%c8, %c0_5], %6 {strides = array<i32>} : memref<36x256xf32, #tpu.memory_space<vmem>>, vector<4x256xf32>,
    %c1_i32 = arith.constant 1 : i32
    %8 = tpu.dynamic_rotate %1 by %c1_i32 dim 1 : vector<4x256xf32>, i32 -> vector<4x256xf32>
    %c12 = arith.constant 12 : index
    %c0_6 = arith.constant 0 : index
    %9 = vector.load %arg10[%c12, %c0_6] : memref<36x256xf32, #tpu.memory_space<vmem>>, vector<4x256xf32>
    tpu.vector_store %arg10[%c12, %c0_6], %8 {strides = array<i32>} : memref<36x256xf32, #tpu.memory_space<vmem>>, vector<4x256xf32>,
    %c16 = arith.constant 16 : index
    %c0_7 = arith.constant 0 : index
    %10 = vector.load %arg10[%c16, %c0_7] : memref<36x256xf32, #tpu.memory_space<vmem>>, vector<4x256xf32>
    tpu.vector_store %arg10[%c16, %c0_7], %1 {strides = array<i32>} : memref<36x256xf32, #tpu.memory_space<vmem>>, vector<4x256xf32>,
    %c255_i32 = arith.constant 255 : i32
    %11 = tpu.dynamic_rotate %1 by %c255_i32 dim 1 : vector<4x256xf32>, i32 -> vector<4x256xf32>
    %c20 = arith.constant 20 : index
    %c0_8 = arith.constant 0 : index
    %12 = vector.load %arg10[%c20, %c0_8] : memref<36x256xf32, #tpu.memory_space<vmem>>, vector<4x256xf32>
    tpu.vector_store %arg10[%c20, %c0_8], %11 {strides = array<i32>} : memref<36x256xf32, #tpu.memory_space<vmem>>, vector<4x256xf32>,
    %c241_i32 = arith.constant 241 : i32
    %13 = tpu.dynamic_rotate %1 by %c241_i32 dim 1 : vector<4x256xf32>, i32 -> vector<4x256xf32>
    %c24 = arith.constant 24 : index
    %c0_9 = arith.constant 0 : index
    %14 = vector.load %arg10[%c24, %c0_9] : memref<36x256xf32, #tpu.memory_space<vmem>>, vector<4x256xf32>
    tpu.vector_store %arg10[%c24, %c0_9], %13 {strides = array<i32>} : memref<36x256xf32, #tpu.memory_space<vmem>>, vector<4x256xf32>,
    %c240_i32 = arith.constant 240 : i32
    %15 = tpu.dynamic_rotate %1 by %c240_i32 dim 1 : vector<4x256xf32>, i32 -> vector<4x256xf32>
    %c28 = arith.constant 28 : index
    %c0_10 = arith.constant 0 : index
    %16 = vector.load %arg10[%c28, %c0_10] : memref<36x256xf32, #tpu.memory_space<vmem>>, vector<4x256xf32>
    tpu.vector_store %arg10[%c28, %c0_10], %15 {strides = array<i32>} : memref<36x256xf32, #tpu.memory_space<vmem>>, vector<4x256xf32>,
    %c239_i32 = arith.constant 239 : i32
    %17 = tpu.dynamic_rotate %1 by %c239_i32 dim 1 : vector<4x256xf32>, i32 -> vector<4x256xf32>
    %c32 = arith.constant 32 : index
    %c0_11 = arith.constant 0 : index
    %18 = vector.load %arg10[%c32, %c0_11] : memref<36x256xf32, #tpu.memory_space<vmem>>, vector<4x256xf32>
    tpu.vector_store %arg10[%c32, %c0_11], %17 {strides = array<i32>} : memref<36x256xf32, #tpu.memory_space<vmem>>, vector<4x256xf32>,
    %c0_12 = arith.constant 0 : index
    %c0_13 = arith.constant 0 : index
    %19 = vector.load %arg10[%c0_12, %c0_13] : memref<36x256xf32, #tpu.memory_space<vmem>>, vector<36x256xf32>
    %c0_14 = arith.constant 0 : index
    %c0_15 = arith.constant 0 : index
    %20 = vector.load %arg2[%c0_14, %c0_15] : memref<36x256xf32, #tpu.memory_space<vmem>>, vector<36x256xf32>
    %21 = arith.mulf %19, %20 : vector<36x256xf32>
    %c0_16 = arith.constant 0 : index
    %c0_17 = arith.constant 0 : index
    %22 = vector.load %arg3[%c0_16, %c0_17] : memref<8x36xf32, #tpu.memory_space<vmem>>, vector<8x36xf32>
    %cst = arith.constant dense<0.000000e+00> : vector<8x256xf32>
    %23 = tpu.matmul %22, %21, %cst {dimension_numbers = #tpu.dot_dimension_numbers<[1], [0], [0], [1], [0, 0, 1, 1], [], []>} : vector<8x36xf32>, vector<36x256xf32>, vector<8x256xf32> -> vector<8x256xf32>
    %c0_18 = arith.constant 0 : index
    %c0_19 = arith.constant 0 : index
    %24 = vector.load %arg4[%c0_18, %c0_19] : memref<8x1xf32, #tpu.memory_space<vmem>>, vector<8x1xf32>
    %25 = vector.broadcast %24 : vector<8x1xf32> to vector<8x256xf32>
    %26 = arith.addf %23, %25 : vector<8x256xf32>
    %cst_20 = arith.constant 0.000000e+00 : f32
    %27 = vector.broadcast %cst_20 : f32 to vector<8x256xf32>
    %28 = arith.maximumf %26, %27 : vector<8x256xf32>
    %c255_i32_21 = arith.constant 255 : i32
    %29 = tpu.dynamic_rotate %28 by %c255_i32_21 dim 1 : vector<8x256xf32>, i32 -> vector<8x256xf32>
    %30 = arith.maximumf %28, %29 : vector<8x256xf32>
    %c240_i32_22 = arith.constant 240 : i32
    %31 = tpu.dynamic_rotate %28 by %c240_i32_22 dim 1 : vector<8x256xf32>, i32 -> vector<8x256xf32>
    %c239_i32_23 = arith.constant 239 : i32
    %32 = tpu.dynamic_rotate %28 by %c239_i32_23 dim 1 : vector<8x256xf32>, i32 -> vector<8x256xf32>
    %33 = arith.maximumf %31, %32 : vector<8x256xf32>
    %34 = arith.maximumf %30, %33 : vector<8x256xf32>
    %c0_24 = arith.constant 0 : index
    %c0_25 = arith.constant 0 : index
    %35 = vector.load %arg5[%c0_24, %c0_25] : memref<256x80xf32, #tpu.memory_space<vmem>>, vector<256x80xf32>
    %cst_26 = arith.constant dense<0.000000e+00> : vector<8x80xf32>
    %36 = tpu.matmul %34, %35, %cst_26 {dimension_numbers = #tpu.dot_dimension_numbers<[1], [0], [0], [1], [0, 0, 1, 1], [], []>} : vector<8x256xf32>, vector<256x80xf32>, vector<8x80xf32> -> vector<8x80xf32>
    %c0_27 = arith.constant 0 : index
    %c0_28 = arith.constant 0 : index
    %37 = vector.load %arg6[%c0_27, %c0_28] : memref<8x80xf32, #tpu.memory_space<vmem>>, vector<8x80xf32>
    %38 = arith.mulf %36, %37 : vector<8x80xf32>
    %cst_29 = arith.constant dense<0.000000e+00> : vector<80xf32>
    %39 = vector.multi_reduction <add>, %38, %cst_29 [0] : vector<8x80xf32> to vector<80xf32>
    %40 = vector.shape_cast %39 : vector<80xf32> to vector<1x80xf32>
    %c0_30 = arith.constant 0 : index
    %c0_31 = arith.constant 0 : index
    %41 = vector.load %arg7[%c0_30, %c0_31] : memref<80x10xf32, #tpu.memory_space<vmem>>, vector<80x10xf32>
    %cst_32 = arith.constant dense<0.000000e+00> : vector<1x10xf32>
    %42 = tpu.matmul %40, %41, %cst_32 {dimension_numbers = #tpu.dot_dimension_numbers<[1], [0], [0], [1], [0, 0, 1, 1], [], []>} : vector<1x80xf32>, vector<80x10xf32>, vector<1x10xf32> -> vector<1x10xf32>
    %c0_33 = arith.constant 0 : index
    %c0_34 = arith.constant 0 : index
    %43 = vector.load %arg8[%c0_33, %c0_34] : memref<1x10xf32, #tpu.memory_space<vmem>>, vector<1x10xf32>
    %44 = arith.addf %42, %43 : vector<1x10xf32>
    %c0_35 = arith.constant 0 : index
    %c0_36 = arith.constant 0 : index
    %c0_37 = arith.constant 0 : index
    %45 = vector.load %arg9[%c0_35, %c0_36, %c0_37] : memref<1x1x10xf32, #tpu.memory_space<vmem>>, vector<1x1x10xf32>
    %46 = vector.shape_cast %45 : vector<1x1x10xf32> to vector<1x10xf32>
    %47 = vector.shape_cast %44 : vector<1x10xf32> to vector<1x1x10xf32>
    tpu.vector_store %arg9[%c0_35, %c0_36, %c0_37], %47 {strides = array<i32>} : memref<1x1x10xf32, #tpu.memory_space<vmem>>, vector<1x1x10xf32>,
    return
  }
  func.func @transform_0(%arg0: i32) -> (i32, i32, i32) {
    %c0_i32 = arith.constant 0 : i32
    %c0_i32_0 = arith.constant 0 : i32
    %c0_i32_1 = arith.constant 0 : i32
    return %arg0, %c0_i32, %c0_i32_0 : i32, i32, i32
  }
  func.func @transform_1(%arg0: i32) -> (i32, i32) {
    %c0_i32 = arith.constant 0 : i32
    %c0_i32_0 = arith.constant 0 : i32
    %c0_i32_1 = arith.constant 0 : i32
    return %c0_i32, %c0_i32_0 : i32, i32
  }
  func.func @transform_2(%arg0: i32) -> (i32, i32) {
    %c0_i32 = arith.constant 0 : i32
    %c0_i32_0 = arith.constant 0 : i32
    %c0_i32_1 = arith.constant 0 : i32
    return %c0_i32, %c0_i32_0 : i32, i32
  }
  func.func @transform_3(%arg0: i32) -> (i32, i32) {
    %c0_i32 = arith.constant 0 : i32
    %c0_i32_0 = arith.constant 0 : i32
    %c0_i32_1 = arith.constant 0 : i32
    return %c0_i32, %c0_i32_0 : i32, i32
  }
  func.func @transform_4(%arg0: i32) -> (i32, i32) {
    %c0_i32 = arith.constant 0 : i32
    %c0_i32_0 = arith.constant 0 : i32
    %c0_i32_1 = arith.constant 0 : i32
    return %c0_i32, %c0_i32_0 : i32, i32
  }
  func.func @transform_5(%arg0: i32) -> (i32, i32) {
    %c0_i32 = arith.constant 0 : i32
    %c0_i32_0 = arith.constant 0 : i32
    %c0_i32_1 = arith.constant 0 : i32
    return %c0_i32, %c0_i32_0 : i32, i32
  }
  func.func @transform_6(%arg0: i32) -> (i32, i32) {
    %c0_i32 = arith.constant 0 : i32
    %c0_i32_0 = arith.constant 0 : i32
    %c0_i32_1 = arith.constant 0 : i32
    return %c0_i32, %c0_i32_0 : i32, i32
  }
  func.func @transform_7(%arg0: i32) -> (i32, i32) {
    %c0_i32 = arith.constant 0 : i32
    %c0_i32_0 = arith.constant 0 : i32
    %c0_i32_1 = arith.constant 0 : i32
    return %c0_i32, %c0_i32_0 : i32, i32
  }
  func.func @transform_8(%arg0: i32) -> (i32, i32, i32) {
    %c0_i32 = arith.constant 0 : i32
    %c0_i32_0 = arith.constant 0 : i32
    %c0_i32_1 = arith.constant 0 : i32
    return %arg0, %c0_i32, %c0_i32_0 : i32, i32, i32
  }
}

</mosaic_0001>

<bundles_post_ra>
// kernel: forward.1
= control target key start
LH: loop header
LB: loop body
LE: loop exit
PB: predicated region body
PF: predicated region fallthrough
CT: control target
= control target key end

     0   :  { %13 = vsyncpa [#allocation4], 0  ;;  %s1560_s0 = inlined_call_operand.vmem [shape: f32[2,4,256], index: 0, kind: input, shape index: {}]   ;;  %s1561_s1 = inlined_call_operand.hbm [shape: f32[36,256], index: 1, kind: input, shape index: {}]   ;;  %s1562_s2 = inlined_call_operand.vmem [shape: f32[8,36], index: 2, kind: input, shape index: {}]   ;;  %s1563_s3 = inlined_call_operand.vmem [shape: f32[8,1], index: 3, kind: input, shape index: {}]   ;;  %s1564_s4 = inlined_call_operand.hbm [shape: f32[256,80], index: 4, kind: input, shape index: {}]   ;;  %s1565_s5 = inlined_call_operand.vmem [shape: f32[8,80], index: 5, kind: input, shape index: {}]   ;;  %s1566_s6 = inlined_call_operand.vmem [shape: f32[80,10], index: 6, kind: input, shape index: {}]   ;;  %s1567_s7 = inlined_call_operand.vmem [shape: f32[1,10], index: 7, kind: input, shape index: {}]   ;;  %s1568_s8 = inlined_call_operand.hbm [shape: f32[2,1,10], index: 8, kind: output, shape index: {}]  }
   0x1   :  { %14 = vsyncpa [#allocation7], 0 }
   0x2   :  { %15 = vsyncpa [#allocation5], 0 }
   0x3   :  { %17 = vsyncpa [#allocation5 + $0x1], 0  ;;  %s1297_s27 = smov 0   ;;  %s1299_s28 = smov 0  }
   0x4   :  { %s1301_s29 = smov 0   ;;  %s1303_s30 = smov 0  }
   0x5 LB: > { %1573 = sst [smem:[#allocation12_spill]] %s1227_s29  ;;  %s1318_s9 = sadd.s32 4294967295, %s1231_s30   ;;  %s1231_s30 = sphi %s1303_s30, %s1590_s30   ;;  %s1227_s29 = sphi %s1301_s29, %s1587_s29   ;;  %s1223_s28 = sphi %s1299_s28, %s1589_s28   ;;  %s1219_s27 = sphi %s1297_s27, %s1588_s27  }
   0x6   : > { %s870_s10 = sadd.s32 4294967294, %s1231_s30   ;;  %s1322_s11 = sadd.s32 1, %s1231_s30  }
   0x7   : > { %s203_s12 = sadd.s32 1, %s1227_s29  ;;  %s200_s13 = ssub.s32 %s1231_s30, %s1322_s11 }
   0x8   : > { %p213_p0 = scmp.ne.s32.totalorder %s1227_s29, %s1223_s28  ;;  %p201_p1 = scmp.eq.s32.totalorder %s200_s13, 0 }
   0x9   : > { %p214_p2 = scmp.eq.s32.totalorder %s1318_s9, 1  ;;  %p219_p3 = scmp.ne.s32.totalorder %s1223_s28, %s1219_s27 }
   0xa   : > { %p220_p4 = scmp.eq.s32.totalorder %s870_s10, 1  ;;  %p871_p7 = scmp.ge.s32.totalorder %s1231_s30, 1 }
   0xb   : > { %s1333_s14 = scalar_select %p201_p1, %s1227_s29, %s203_s12  }
   0xc   : > { %p1335_p5 = por %p214_p2, %p213_p0  ;;  %p1339_p6 = por %p220_p4, %p219_p3 }
   0xd   : > { %1574 = sst [smem:[#allocation13_spill]] %s1333_s14  ;;  %p227_p8 = scmp.lt.s32.totalorder %s1231_s30, 3 }
   0xe   : > { %s1575_s15 = scalar_select %p1335_p5, 1, 0 }
   0xf   : > { %s1576_s16 = scalar_select %p1339_p6, 1, 0 }
  0x10   : > { %p1569_p9 = scmp.eq.s32.totalorder %s1318_s9, 0  ;;  %p1346_p10 = pnand %p871_p7, %p227_p8 }
  0x11   : > { %s1233_s18 = smov [#allocation3]   ;;  %s1234_s21 = smov [#allocation6]  }
  0x12   : > { %s1577_s17 = scalar_select %p1346_p10, 1, 0 }
  0x13   : > { %s239_s19 = sshll.u32 %s1233_s18, 4  ;;  %p1022_p11 = pneg %p1346_p10  ;;  %s240_s19 = int_to_ptr.vmem [resolvable:$true] %s239_s19 }
  0x14   : > { %s258_s22 = sshll.u32 %s1234_s21, 4  ;;  %s1105_s25 = scalar_lea.hbm %s1561_s1, 1280  ;;  %s1358_s22 = int_to_ptr.vmem [resolvable:$true] %s258_s22 }
  0x15   : > { %p1354_p12 = pnand %p1569_p9, %p1022_p11  ;;  %p1106_p13 = scmp.ne.s32.totalorder %s1561_s1, %s1105_s25 }
  0x16   : > { %p1112_p3 = scmp.lt.u32.totalorder %s1105_s25, %s1561_s1 }
  0x17   : > { %p1107_p0 = pneg %p1354_p12 }
  0x19   : > { %p1108_p1 = pnand %p1107_p0, %p1106_p13 }
  0x1b   : > { %p1109_p2 = pneg %p1108_p1 }
  0x1d   : > { %p1114_p4 = pnand %p1112_p3, %p1109_p2 }
  0x1f   : > { %1117 = shalt.err (!%p1114_p4)
}
  0x20   : > { %s1118_s18 = scalar_lea.vmem %s240_s19, 1280  ;;  %p1126_p9 = scmp.lt.s32.totalorder %s240_s19, %s240_s19 }
  0x21   : > { %p1119_p7 = scmp.ne.s32.totalorder %s240_s19, %s1118_s18  ;;  %p1127_p6 = scmp.lt.s32.totalorder %s1118_s18, %s1118_s18 }
  0x23   : > { %p1121_p8 = pnand %p1119_p7, %p1107_p0  ;;  %p1128_p5 = por %p1127_p6, %p1126_p9 }
  0x25   : > { %p1122_p11 = pneg %p1121_p8 }
  0x27   : > { %p1129_p10 = pnand %p1128_p5, %p1122_p11 }
  0x29   : > { %1132 = shalt.err (!%p1129_p10)
}
  0x2a   : > { %s1235_s21 = smov 256   ;;  %s1236_s23 = smov 16  }
  0x2b   : > { %1025 = dma.hbm_to_vmem [thread:$0]  (!%p1354_p12), %s1561_s1, 1280, %s240_s19, [#allocation4], %s1235_s21, %s1235_s21, %s1236_s23  }
  0x2c   : > { %s1133_s12 = scalar_lea.hbm %s1564_s4, 4096 }
  0x2d   : > { %p1134_p13 = scmp.ne.s32.totalorder %s1564_s4, %s1133_s12  ;;  %p1140_p9 = scmp.lt.u32.totalorder %s1133_s12, %s1564_s4 }
  0x2f   : > { %p1136_p5 = pnand %p1134_p13, %p1107_p0 }
  0x31   : > { %p1137_p6 = pneg %p1136_p5 }
  0x33   : > { %p1142_p10 = pnand %p1140_p9, %p1137_p6 }
  0x35   : > { %1145 = shalt.err (!%p1142_p10)
}
  0x36   : > { %s1146_s19 = scalar_lea.vmem %s1358_s22, 4096  ;;  %p1154_p4 = scmp.lt.s32.totalorder %s1358_s22, %s1358_s22 }
  0x37   : > { %p1147_p1 = scmp.ne.s32.totalorder %s1358_s22, %s1146_s19  ;;  %p1155_p7 = scmp.lt.s32.totalorder %s1146_s19, %s1146_s19 }
  0x39   : > { %p1149_p2 = pnand %p1147_p1, %p1107_p0  ;;  %p1156_p8 = por %p1155_p7, %p1154_p4 }
  0x3b   : > { %p1150_p3 = pneg %p1149_p2 }
  0x3d   : > { %p1157_p11 = pnand %p1156_p8, %p1150_p3 }
  0x3f   : > { %1160 = shalt.err (!%p1157_p11)
}
  0x40   : > { %s1237_s29 = smov 128   ;;  %s1238_s14 = smov 8  }
  0x41   : > { %1028 = dma.hbm_to_vmem [thread:$0]  (!%p1354_p12), %s1564_s4, 4096, %s1358_s22, [#allocation7], %s1237_s29, %s1237_s29, %s1238_s14  }
  0x42   : > { %p1579_p13 = scmp.ne.s32.totalorder %s1577_s17, 0 }
  0x43   : > { %p1580_p0 = scmp.eq.s32.totalorder (!%p1579_p13), %s1318_s9, 0 }
  0x44   : > { %291 = sbr.rel (%p1579_p13) target bundleno = 1048 (0x418), region = 52 }
  0x4b   : > { %1206 = dma.done.wait (%p1580_p0), [#allocation4], 1280   ;;  %p1581_p5 = pmov %p1580_p0 }
  0x4c   : > { %p1582_p6 = pmov %p1580_p0 }
  0x4d   : > { %1208 = vsyncadd (%p1581_p5), [#allocation4], 4294966016 }
  0x4e   : > { %1210 = dma.done.wait (%p1582_p6), [#allocation7], 4096   ;;  %p1583_p9 = pmov %p1580_p0 }
  0x4f   : > { %p328_p10 = scmp.lt.s32.totalorder %s1318_s9, 1  ;;  %s1239_s26 = smov 1   ;;  %v1247_v2 = vmov 0.0   ;;  %v468_v3 = vld [vmem:[%s1563_s3] sm:$0xff]  ;;  %v1248_v4 = vmov 0   ;;  %v341_v5 = vlaneseq  ;;  %v448_v33 = vld [vmem:[#allocation3 + $0x8] sm:$0xff] }
  0x50   : > { %1212 = vsyncadd (%p1583_p9), [#allocation7], 4294963200  ;;  %s1240_s10 = smov 16   ;;  %s1241_s12 = smov 17   ;;  %549 = vmatprep.mubr.f32.mxu0 %v1247_v2  ;;  %1088 = vset.pattern.permute.xlu0 %v1248_v4  ;;  %v450_v34 = vld [vmem:[#allocation3 + $0x18] sm:$0xff]  ;;  %v447_v35 = vld [vmem:[#allocation3] sm:$0xff] }
  0x51   : > { %s329_s20 = scalar_select %p328_p10, %s1318_s9, 1  ;;  %v1432_v6 = vand.u32 127, %v341_v5  ;;  %v449_v38 = vld [vmem:[#allocation3 + $0x10] sm:$0xff]  ;;  %v452_v61 = vld [vmem:[#allocation3 + $0x28] sm:$0xff]  ;;  %v454_v62 = vld [vmem:[#allocation3 + $0x38] sm:$0xff]  ;;  %vm478_vm8 = vcmask 1043456  }
  0x52   : > { %s1242_s13 = smov 15   ;;  %s1243_s18 = smov 127   ;;  %v451_v63 = vld [vmem:[#allocation3 + $0x20] sm:$0xff]  ;;  %vm474_vm9 = vcmask 293888   ;;  %vm1250_vm10 = vmmov 0   ;;  %vm686_vm11 = vcmask 654336  }
  0x53   : > { %s887_s22 = sshll.u32 %s329_s20, 3  ;;  %s1244_s19 = smov 112   ;;  %vm376_vm0 = vcmp.lt.s32.totalorder %v1432_v6, 1  ;;  %vm343_vm1 = vcmp.lt.s32.totalorder %v1432_v6, 17  ;;  %vm352_vm2 = vcmp.lt.s32.totalorder %v1432_v6, 16  ;;  %vm367_vm3 = vcmp.lt.s32.totalorder %v1432_v6, 15 }
  0x54   : > { %s332_s25 = scalar_lea.vmem %s1560_s0, %s887_s22  ;;  %s1245_s29 = smov 113   ;;  %vm393_vm4 = vcmp.lt.s32.totalorder %v1432_v6, 127  ;;  %vm417_vm5 = vcmp.lt.s32.totalorder %v1432_v6, 112  ;;  %vm408_vm6 = vcmp.lt.s32.totalorder %v1432_v6, 113  ;;  %vm432_vm7 = vcmp.lt.s32.totalorder %v1432_v6, 111  ;;  %v696_v6 = vld [vmem:[%s1566_s6 + $0x10] sm:$0xff] }
  0x55   : > { %v333_v0 = vld [vmem:[%s332_s25] sm:$0xff]  ;;  %s1246_s14 = smov 111   ;;  %vm778_vm12 = vcmask 73728   ;;  %p1584_p1 = scmp.ne.s32.totalorder %s1575_s15, 0 }
  0x56   : > { %372 = vrot.lane.b32.xlu1 %v333_v0, %s1239_s26  ;;  %387 = vst [vmem:[#allocation2 + $0x20] sm:$0xf] %v333_v0  ;;  %348 = vrot.lane.b32.xlu0 %v333_v0, %s1240_s10  ;;  %v335_v1 = vcombine.high %v333_v0, %v333_v0 }
  0x58   : > { %388 = vst [vmem:[#allocation2 + $0x28] sm:$0xf] %v335_v1 }
  0x5a   : > { %337 = vrot.lane.b32.xlu0 %v333_v0, %s1241_s12  ;;  %374 = vrot.lane.b32.xlu1 %v335_v1, %s1239_s26 }
  0x5e   : > { %339 = vrot.lane.b32.xlu1 %v335_v1, %s1241_s12  ;;  %350 = vrot.lane.b32.xlu0 %v335_v1, %s1240_s10 }
  0x62   : > { %365 = vrot.lane.b32.xlu1 %v335_v1, %s1242_s13  ;;  %363 = vrot.lane.b32.xlu0 %v333_v0, %s1242_s13 }
  0x66   : > { %391 = vrot.lane.b32.xlu1 %v335_v1, %s1243_s18  ;;  %389 = vrot.lane.b32.xlu0 %v333_v0, %s1243_s18 }
  0x6a   : > { %415 = vrot.lane.b32.xlu1 %v335_v1, %s1244_s19  ;;  %413 = vrot.lane.b32.xlu0 %v333_v0, %s1244_s19 }
  0x6e   : > { %406 = vrot.lane.b32.xlu1 %v335_v1, %s1245_s29  ;;  %404 = vrot.lane.b32.xlu0 %v333_v0, %s1245_s29 }
  0x72   : > { %430 = vrot.lane.b32.xlu1 %v335_v1, %s1246_s14  ;;  %428 = vrot.lane.b32.xlu0 %v333_v0, %s1246_s14 }
  0x76   : > { %471 = vperm.xlu0 %1088, %v468_v3   ;;  %v453_v3 = vld [vmem:[#allocation3 + $0x30] sm:$0xff] }
  0xc8   : > { %v373_v7 = vpop.permute.xlu1 %372  ;;  %v349_v8 = vpop.permute.xlu0 %348 }
  0xcc   : > { %v338_v9 = vpop.permute.xlu0 %337  ;;  %v375_v10 = vpop.permute.xlu1 %374 }
  0xcd   : > { %v377_v11 = vsel %vm376_vm0, %v373_v7, %v375_v10  ;;  %v378_v12 = vsel %vm376_vm0, %v375_v10, %v373_v7 }
  0xce   : > { %v381_v13 = vrot.slane %v378_v12, 4  ;;  %v382_v14 = vrot.slane %v377_v11, 4  ;;  %v456_v11 = vld [vmem:[#allocation3 + $0x48] sm:$0xf] }
  0xd0   : > { %385 = vst [vmem:[#allocation2 + $0x10] sm:$0xf0] %v381_v13  ;;  %386 = vst [vmem:[#allocation2 + $0x18] sm:$0xf0] %v382_v14  ;;  %v340_v15 = vpop.permute.xlu1 %339  ;;  %v351_v16 = vpop.permute.xlu0 %350  ;;  %v455_v14 = vld [vmem:[#allocation3 + $0x40] sm:$0xf] }
  0xd1   : > { %v344_v17 = vsel %vm343_vm1, %v338_v9, %v340_v15  ;;  %v345_v18 = vsel %vm343_vm1, %v340_v15, %v338_v9  ;;  %v353_v19 = vsel %vm352_vm2, %v349_v8, %v351_v16  ;;  %v354_v20 = vsel %vm352_vm2, %v351_v16, %v349_v8 }
  0xd2   : > { %346 = vst [vmem:[#allocation2] sm:$0xf] %v345_v18  ;;  %347 = vst [vmem:[#allocation2 + $0x8] sm:$0xf] %v344_v17  ;;  %v357_v21 = vrot.slane %v354_v20, 4  ;;  %v358_v22 = vrot.slane %v353_v19, 4 }
  0xd3   : > { %v467_v19 = vld [vmem:[%s1562_s2] sm:$0xff] }
  0xd4   : > { %361 = vst [vmem:[#allocation2] sm:$0xf0] %v357_v21  ;;  %362 = vst [vmem:[#allocation2 + $0x8] sm:$0xf0] %v358_v22  ;;  %v366_v23 = vpop.permute.xlu1 %365  ;;  %v364_v24 = vpop.permute.xlu0 %363  ;;  %v598_v20 = vld [vmem:[#allocation6 + $0x80] sm:$0xff]  ;;  %v599_v21 = vld [vmem:[#allocation6 + $0x88] sm:$0xff] }
  0xd5   : > { %v368_v25 = vsel %vm367_vm3, %v364_v24, %v366_v23  ;;  %v369_v26 = vsel %vm367_vm3, %v366_v23, %v364_v24  ;;  %v582_v22 = vld [vmem:[#allocation6] sm:$0xff]  ;;  %v965_v23 = vpack.c.bf16 %v599_v21, %v598_v20  ;;  %v583_v24 = vld [vmem:[#allocation6 + $0x8] sm:$0xff] }
  0xd6   : > { %370 = vst [vmem:[#allocation2 + $0x10] sm:$0xf] %v369_v26  ;;  %371 = vst [vmem:[#allocation2 + $0x18] sm:$0xf] %v368_v25  ;;  %v600_v25 = vld [vmem:[#allocation6 + $0x90] sm:$0xff]  ;;  %v601_v26 = vld [vmem:[#allocation6 + $0x98] sm:$0xff] }
  0xd7   : > { %966 = vmatprep.subr.bf16.mxu1 %v965_v23 }
  0xd8   : > { %v392_v27 = vpop.permute.xlu1 %391  ;;  %v390_v28 = vpop.permute.xlu0 %389 }
  0xd9   : > { %v394_v29 = vsel %vm393_vm4, %v390_v28, %v392_v27  ;;  %v395_v30 = vsel %vm393_vm4, %v392_v27, %v390_v28  ;;  %v967_v27 = vpack.c.bf16 %v583_v24, %v582_v22  ;;  %v969_v28 = vpack.c.bf16 %v601_v26, %v600_v25 }
  0xda   : > { %v398_v31 = vrot.slane %v394_v29, 4  ;;  %v399_v32 = vrot.slane %v395_v30, 4  ;;  %v584_v29 = vld [vmem:[#allocation6 + $0x10] sm:$0xff]  ;;  %v585_v30 = vld [vmem:[#allocation6 + $0x18] sm:$0xff] }
  0xdb   : > { %v438_v36 = vld [vmem:[#allocation2 + $0x8] sm:$0xff]  ;;  %v437_v37 = vld [vmem:[#allocation2] sm:$0xff]  ;;  %968 = vmatpush3.bf16.msra.mxu1 %v967_v27 }
  0xdc   : > { %402 = vst [vmem:[#allocation2 + $0x20] sm:$0xf0] %v398_v31  ;;  %403 = vst [vmem:[#allocation2 + $0x28] sm:$0xf0] %v399_v32  ;;  %v416_v39 = vpop.permute.xlu1 %415  ;;  %v414_v40 = vpop.permute.xlu0 %413  ;;  %v458_v44 = vmul.f32 %v448_v33, %v438_v36  ;;  %v457_v46 = vmul.f32 %v447_v35, %v437_v37  ;;  %v602_v31 = vld [vmem:[#allocation6 + $0xa0] sm:$0xff]  ;;  %v603_v32 = vld [vmem:[#allocation6 + $0xa8] sm:$0xff]  ;;  %v971_v33 = vpack.c.bf16 %v585_v30, %v584_v29  ;;  %970 = vmatprep.subr.bf16.mxu1 %v969_v28 }
  0xdd   : > { %v418_v41 = vsel %vm417_vm5, %v414_v40, %v416_v39  ;;  %v419_v42 = vsel %vm417_vm5, %v416_v39, %v414_v40  ;;  %v440_v43 = vld [vmem:[#allocation2 + $0x18] sm:$0xff]  ;;  %v439_v45 = vld [vmem:[#allocation2 + $0x10] sm:$0xff]  ;;  %v586_v35 = vld [vmem:[#allocation6 + $0x20] sm:$0xff] }
  0xde   : > { %v422_v47 = vrot.slane %v418_v41, 4  ;;  %v423_v48 = vrot.slane %v419_v42, 4  ;;  %v460_v49 = vmul.f32 %v450_v34, %v440_v43  ;;  %v459_v50 = vmul.f32 %v449_v38, %v439_v45  ;;  %v587_v36 = vld [vmem:[#allocation6 + $0x28] sm:$0xff]  ;;  %v604_v37 = vld [vmem:[#allocation6 + $0xb0] sm:$0xff]  ;;  %v605_v38 = vld [vmem:[#allocation6 + $0xb8] sm:$0xff] }
  0xdf   : > { %v973_v34 = vpack.c.bf16 %v603_v32, %v602_v31  ;;  %972 = vmatpush3.bf16.msra.mxu1 %v971_v33  ;;  %v975_v39 = vpack.c.bf16 %v587_v36, %v586_v35  ;;  %v977_v40 = vpack.c.bf16 %v605_v38, %v604_v37  ;;  %v588_v41 = vld [vmem:[#allocation6 + $0x30] sm:$0xff]  ;;  %v589_v42 = vld [vmem:[#allocation6 + $0x38] sm:$0xff]  ;;  %v606_v43 = vld [vmem:[#allocation6 + $0xc0] sm:$0xff] }
  0xe0   : > { %426 = vst [vmem:[#allocation2 + $0x30] sm:$0xf0] %v422_v47  ;;  %427 = vst [vmem:[#allocation2 + $0x38] sm:$0xf0] %v423_v48  ;;  %v407_v51 = vpop.permute.xlu1 %406  ;;  %v405_v52 = vpop.permute.xlu0 %404  ;;  %v957_v53 = vpack.c.bf16 %v460_v49, %v458_v44  ;;  %v959_v54 = vpack.c.bf16 %v459_v50, %v457_v46  ;;  %v607_v44 = vld [vmem:[#allocation6 + $0xc8] sm:$0xff]  ;;  %v979_v45 = vpack.c.bf16 %v589_v42, %v588_v41  ;;  %v590_v47 = vld [vmem:[#allocation6 + $0x40] sm:$0xff] }
  0xe1   : > { %v409_v55 = vsel %vm408_vm6, %v405_v52, %v407_v51  ;;  %v410_v56 = vsel %vm408_vm6, %v407_v51, %v405_v52  ;;  %974 = vmatprep.subr.bf16.mxu1 %v973_v34  ;;  %v981_v46 = vpack.c.bf16 %v607_v44, %v606_v43  ;;  %v591_v48 = vld [vmem:[#allocation6 + $0x48] sm:$0xff]  ;;  %v608_v50 = vld [vmem:[#allocation6 + $0xd0] sm:$0xff]  ;;  %v609_v51 = vld [vmem:[#allocation6 + $0xd8] sm:$0xff] }
  0xe2   : > { %411 = vst [vmem:[#allocation2 + $0x30] sm:$0xf] %v409_v55  ;;  %412 = vst [vmem:[#allocation2 + $0x38] sm:$0xf] %v410_v56  ;;  %958 = vmatprep.subr.bf16.mxu0 %v957_v53  ;;  %v983_v49 = vpack.c.bf16 %v591_v48, %v590_v47  ;;  %v985_v52 = vpack.c.bf16 %v609_v51, %v608_v50  ;;  %v592_v53 = vld [vmem:[#allocation6 + $0x50] sm:$0xff]  ;;  %v610_v56 = vld [vmem:[#allocation6 + $0xe0] sm:$0xff] }
  0xe3   : > { %960 = vmatpush1.bf16.msra.mxu0 %v959_v54  ;;  %v442_v0 = vld [vmem:[#allocation2 + $0x28] sm:$0xff]  ;;  %v441_v1 = vld [vmem:[#allocation2 + $0x20] sm:$0xff]  ;;  %976 = vmatpush3.bf16.msra.mxu1 %v975_v39  ;;  %v593_v54 = vld [vmem:[#allocation6 + $0x58] sm:$0xff] }
  0xe4   : > { %v431_v57 = vpop.permute.xlu1 %430  ;;  %v429_v58 = vpop.permute.xlu0 %428  ;;  %v462_v7 = vmul.f32 %v452_v61, %v442_v0  ;;  %v461_v9 = vmul.f32 %v451_v63, %v441_v1  ;;  %978 = vmatprep.subr.bf16.mxu1 %v977_v40  ;;  %v987_v55 = vpack.c.bf16 %v593_v54, %v592_v53  ;;  %v612_v0 = vld [vmem:[#allocation6 + $0xf0] sm:$0xff]  ;;  %v613_v1 = vld [vmem:[#allocation6 + $0xf8] sm:$0xff]  ;;  %v694_v36 = vld [vmem:[%s1566_s6] sm:$0xff] }
  0xe5   : > { %v433_v59 = vsel %vm432_vm7, %v429_v58, %v431_v57  ;;  %v434_v60 = vsel %vm432_vm7, %v431_v57, %v429_v58  ;;  %v611_v57 = vld [vmem:[#allocation6 + $0xe8] sm:$0xff]  ;;  %v697_v39 = vld [vmem:[%s1566_s6 + $0x18] sm:$0xff]  ;;  %v698_v41 = vld [vmem:[%s1566_s6 + $0x20] sm:$0xff] }
  0xe6   : > { %435 = vst [vmem:[#allocation2 + $0x40] sm:$0xf] %v433_v59  ;;  %436 = vst [vmem:[#allocation2 + $0x48] sm:$0xf] %v434_v60  ;;  %v989_v58 = vpack.c.bf16 %v611_v57, %v610_v56  ;;  %v594_v59 = vld [vmem:[#allocation6 + $0x60] sm:$0xff]  ;;  %v595_v60 = vld [vmem:[#allocation6 + $0x68] sm:$0xff]  ;;  %v1001_v40 = vpack.c.bf16 %v697_v39, %v696_v6 }
  0xe7   : > { %980 = vmatpush3.bf16.msra.mxu1 %v979_v45  ;;  %v695_v37 = vld [vmem:[%s1566_s6 + $0x8] sm:$0xff]  ;;  %v700_v44 = vld [vmem:[%s1566_s6 + $0x30] sm:$0xff]  ;;  %v701_v45 = vld [vmem:[%s1566_s6 + $0x38] sm:$0xff] }
  0xe8   : > { %982 = vmatprep.subr.bf16.mxu1 %v981_v46  ;;  %v998_v38 = vpack.c.bf16 %v695_v37, %v694_v36  ;;  %v699_v42 = vld [vmem:[%s1566_s6 + $0x28] sm:$0xff]  ;;  %v1007_v46 = vpack.c.bf16 %v701_v45, %v700_v44  ;;  %v702_v47 = vld [vmem:[%s1566_s6 + $0x40] sm:$0xff] }
  0xe9   : > { %v444_v4 = vld [vmem:[#allocation2 + $0x38] sm:$0xff]  ;;  %v443_v5 = vld [vmem:[#allocation2 + $0x30] sm:$0xff]  ;;  %v1004_v43 = vpack.c.bf16 %v699_v42, %v698_v41  ;;  %v703_v48 = vld [vmem:[%s1566_s6 + $0x48] sm:$0xff] }
  0xea   : > { %v464_v8 = vmul.f32 %v454_v62, %v444_v4  ;;  %v463_v10 = vmul.f32 %v453_v3, %v443_v5  ;;  %v991_v62 = vpack.c.bf16 %v595_v60, %v594_v59  ;;  %v993_v5 = vpack.c.bf16 %v613_v1, %v612_v0 }
  0xeb   : > { %984 = vmatpush3.bf16.msra.mxu1 %v983_v49  ;;  %v1010_v49 = vpack.c.bf16 %v703_v48, %v702_v47 }
  0xec   : > { %v961_v12 = vpack.c.bf16 %v464_v8, %v462_v7  ;;  %v963_v13 = vpack.c.bf16 %v463_v10, %v461_v9  ;;  %986 = vmatprep.subr.bf16.mxu1 %v985_v52  ;;  %v596_v7 = vld [vmem:[#allocation6 + $0x70] sm:$0xff]  ;;  %v597_v8 = vld [vmem:[#allocation6 + $0x78] sm:$0xff]  ;;  %v684_v52 = vld [vmem:[%s1565_s5] sm:$0xff] }
  0xed   : > { %v446_v15 = vld [vmem:[#allocation2 + $0x48] sm:$0xf]  ;;  %v445_v16 = vld [vmem:[#allocation2 + $0x40] sm:$0xf]  ;;  %v995_v10 = vpack.c.bf16 %v597_v8, %v596_v7 }
  0xee   : > { %962 = vmatprep.subr.bf16.mxu0 %v961_v12  ;;  %v466_v17 = vmul.f32 %v456_v11, %v446_v15  ;;  %v465_v18 = vmul.f32 %v455_v14, %v445_v16  ;;  %v1249_v14 = vmov 0.0|0.0  }
  0xef   : > { %964 = vmatpush1.bf16.msra.mxu0 %v963_v13  ;;  %988 = vmatpush3.bf16.msra.mxu1 %v987_v55 }
  0xf0   : > { %880 = vmatprep.subr.msk.mxu0 %vm478_vm8, %v466_v17  ;;  %990 = vmatprep.subr.bf16.mxu1 %v989_v58 }
  0xf3   : > { %881 = vmatpush1.msk.msra.mxu0 %vm478_vm8, %v465_v18  ;;  %992 = vmatpush3.bf16.msra.mxu1 %v991_v62 }
  0xf4   : > { %882 = vmatmul.mubr.msk.f32.vlgmr.msra.gmra.mrb[0].mxu0 %vm474_vm9, %v467_v19  ;;  %994 = vmatprep.subr.bf16.mxu1 %v993_v5 }
  0xf5   : > { %v472_v61 = vpop.permute.xlu0 %471  ;;  %997 = vmatprep.subr.bf16.mxu0 %v1249_v14  ;;  %954 = vmatprep.mubr.msk.f32.mxu0 %vm1250_vm10, %v1247_v2  ;;  %v704_v2 = vld [vmem:[%s1567_s7] sm:$0x1] }
  0xf6   : > { %999 = vmatpush3.bf16.msra.mxu0 %v998_v38 }
  0xf7   : > { %996 = vmatpush3.bf16.msra.mxu1 %v995_v10  ;;  %1000 = vmatprep.subr.bf16.mxu0 %v1249_v14 }
  0xfa   : > { %1002 = vmatpush3.bf16.msra.mxu0 %v1001_v40 }
  0xfb   : > { %1003 = vmatprep.subr.bf16.mxu0 %v1249_v14 }
  0xfe   : > { %1005 = vmatpush3.bf16.msra.mxu0 %v1004_v43 }
  0xff   : > { %1006 = vmatprep.subr.bf16.mxu0 %v1249_v14 }
 0x102   : > { %1008 = vmatpush3.bf16.msra.mxu0 %v1007_v46 }
 0x103   : > { %1009 = vmatprep.subr.bf16.mxu0 %v1249_v14 }
 0x106   : > { %1011 = vmatpush3.bf16.msra.mxu0 %v1010_v49 }
 0x1c7   : > { %v551_v63 = vpop.f32.mrb[0].mxu0 }
 0x1c8   : > { %v552_v3 = vadd.f32 %v551_v63, %v472_v61  ;;  %v553_v4 = vpop.f32.mrb[1].mxu0 }
 0x1c9   : > { %v554_v9 = vadd.f32 %v553_v4, %v472_v61 }
 0x1ca   : > { %v556_v11 = vmax.f32 %v552_v3, 0.0 }
 0x1cb   : > { %v557_v12 = vmax.f32 %v554_v9, 0.0 }
 0x1cd   : > { %v1099_v13 = vpack.i.bf16 %v557_v12, %v556_v11 }
 0x1cf   : > { %1100 = vrot.lane.b32.xlu0 %v1099_v13, %s1246_s14  ;;  %1090 = vrot.lane.b32.xlu1 %v1099_v13, %s1243_s18  ;;  %s326_s18 = sand.u32 1, %s1223_s28   ;;  %s884_s14 = sshll.u32 %s1318_s9, 4 }
 0x1d0   : > { %s327_s21 = scalar_lea.vmem [#allocation8], %s326_s18  ;;  %s1518_s24 = scalar_lea.hbm %s1568_s8, %s884_s14 }
 0x1d1   : > { %s793_s23 = sshll.u32 %s327_s21, 4  ;;  %s781_s17 = scalar_lea.sflag [#allocation5], %s326_s18  ;;  %s1520_s23 = int_to_ptr.vmem [resolvable:$true] %s793_s23 }
 0x1d2   : > { %s1161_s25 = scalar_lea.vmem %s1520_s23, 16  ;;  %s1251_s9 = smov [#allocation8]  }
 0x1d3   : > { %1095 = vrot.lane.b32.xlu1 %v1099_v13, %s1244_s19  ;;  %p1162_p12 = scmp.ne.s32.totalorder %s1520_s23, %s1161_s25  ;;  %s1165_s26 = sshll.u32 %s1251_s9, 4  ;;  %s1166_s26 = int_to_ptr.vmem [resolvable:$false] %s1165_s26 }
 0x1d4   : > { %s1167_s10 = scalar_lea.vmem %s1166_s26, 32  ;;  %p1168_p4 = scmp.lt.s32.totalorder %s1520_s23, %s1166_s26 }
 0x1d5   : > { %p1163_p2 = pnand %p1162_p12, %p1584_p1  ;;  %p1169_p7 = scmp.lt.s32.totalorder %s1167_s10, %s1161_s25 }
 0x1d7   : > { %p1164_p3 = pneg %p1163_p2  ;;  %p1170_p8 = por %p1169_p7, %p1168_p4 }
 0x1d9   : > { %p1171_p11 = pnand %p1170_p8, %p1164_p3 }
 0x241   : > { %v1101_v15 = vpop.permute.xlu0 %1100  ;;  %v1091_v16 = vpop.permute.xlu1 %1090 }
 0x242   : > { %v1093_v17 = vunpack.i.h.bf16 %v1091_v16  ;;  %v1092_v18 = vunpack.i.l.bf16 %v1091_v16  ;;  %v1103_v19 = vunpack.i.h.bf16 %v1101_v15  ;;  %v1102_v20 = vunpack.i.l.bf16 %v1101_v15 }
 0x244   : > { %v562_v22 = vsel %vm393_vm4, %v1092_v18, %v1093_v17  ;;  %v563_v25 = vsel %vm393_vm4, %v1093_v17, %v1092_v18  ;;  %v576_v26 = vsel %vm432_vm7, %v1102_v20, %v1103_v19  ;;  %v577_v29 = vsel %vm432_vm7, %v1103_v19, %v1102_v20 }
 0x245   : > { %v1096_v21 = vpop.permute.xlu1 %1095  ;;  %v565_v30 = vmax.f32 %v557_v12, %v563_v25  ;;  %v564_v32 = vmax.f32 %v556_v11, %v562_v22 }
 0x246   : > { %v1098_v23 = vunpack.i.h.bf16 %v1096_v21  ;;  %v1097_v24 = vunpack.i.l.bf16 %v1096_v21 }
 0x248   : > { %v570_v27 = vsel %vm417_vm5, %v1097_v24, %v1098_v23  ;;  %v571_v28 = vsel %vm417_vm5, %v1098_v23, %v1097_v24 }
 0x249   : > { %v579_v31 = vmax.f32 %v571_v28, %v577_v29  ;;  %v578_v33 = vmax.f32 %v570_v27, %v576_v26 }
 0x24b   : > { %v581_v34 = vmax.f32 %v565_v30, %v579_v31  ;;  %v580_v35 = vmax.f32 %v564_v32, %v578_v33 }
 0x24d   : > { %678 = vmatprep.mubr.f32.mxu1 %v581_v34 }
 0x24e   : > { %679 = vmatmul.mubr.f32.vlgmr.msra.gmra.mrb[0].mxu1 %v580_v35 }
 0x321   : > { %v920_v50 = vpop.f32.mrb[0].mxu1 }
 0x322   : > { %v921_v51 = vpop.f32.mrb[1].mxu1 }
 0x323   : > { %v922_v53 = vadd.f32 %v921_v51, %v920_v50 }
 0x325   : > { %v685_v54 = vmul.f32 %v922_v53, %v684_v52 }
 0x327   : > { %v687_v55 = vsel %vm686_vm11, %v685_v54, 0.0 }
 0x328   : > { %v688_v56 = vrot.slane %v687_v55, 4 }
 0x32a   : > { %v689_v57 = vadd.f32 %v688_v56, %v687_v55 }
 0x32c   : > { %v690_v58 = vrot.slane %v689_v57, 2 }
 0x32e   : > { %v691_v59 = vadd.f32 %v690_v58, %v689_v57 }
 0x330   : > { %v692_v60 = vrot.slane %v691_v59, 1 }
 0x332   : > { %v693_v61 = vadd.f32 %v692_v60, %v691_v59 }
 0x334   : > { %955 = vmatmul.mubr.msk.f32.vlgmr.msra.gmra.mrb[2].mxu0 %vm686_vm11, %v693_v61 }
 0x407   : > { %v774_v62 = vpop.f32.mrb[2].mxu0 }
 0x408   : > { %v775_v63 = vadd.f32 %v774_v62, %v704_v2  ;;  %v956_v0 = vpop.f32.mrb[3].mxu0 }
 0x40a   : > { %779 = vst.msk [vmem:[%s327_s21] sm:$0x1] %vm778_vm12, %v775_v63 }
 0x40b   : > { %1174 = shalt.err (!%p1171_p11)
}
 0x40c   : > { %s1175_s12 = scalar_lea.hbm %s1518_s24, 16  ;;  %s1179_s19 = scalar_lea.hbm %s1568_s8, 32 }
 0x40d   : > { %p1176_p13 = scmp.ne.s32.totalorder %s1518_s24, %s1175_s12  ;;  %p1180_p6 = scmp.lt.u32.totalorder %s1518_s24, %s1568_s8 }
 0x40e   : > { %p1181_p9 = scmp.lt.u32.totalorder %s1179_s19, %s1175_s12  ;;  %p1183_p12 = scmp.lt.u32.totalorder %s1175_s12, %s1518_s24 }
 0x40f   : > { %p1177_p0 = pnand %p1176_p13, %p1584_p1 }
 0x410   : > { %p1182_p10 = por %p1181_p9, %p1180_p6 }
 0x411   : > { %p1178_p5 = pneg %p1177_p0 }
 0x412   : > { %p1184_p2 = por %p1183_p12, %p1182_p10 }
 0x414   : > { %p1185_p3 = pnand %p1184_p2, %p1178_p5 }
 0x416   : > { %1188 = shalt.err (!%p1185_p3)
}
 0x417   : > { %1020 = dma.vmem_to_hbm [thread:$0]  (%p1584_p1), %s1520_s23, 16, %s1518_s24, %s781_s17  }
 0x418 PF: > { %p1037_p4 = scmp.ge.s32.totalorder %s1231_s30, 2  ;;  %s805_s21 = sand.u32 1, %s1219_s27  }
 0x419   : > { %p1585_p7 = scmp.ne.s32.totalorder %s1576_s16, 0  ;;  %s806_s20 = scalar_lea.sflag [#allocation5], %s805_s21 }
 0x41b   : > { %p1030_p8 = pnand %p1037_p4, %p1585_p7 }
 0x41d   : > { %1214 = dma.done.wait (!%p1030_p8), %s806_s20, 16  }
 0x41e   : > { %1216 = vsyncadd (!%p1030_p8), %s806_s20, 4294967280  ;;  %s1586_s22 = sld [smem:[#allocation12_spill]]  ;;  %s1587_s29 = sld [smem:[#allocation13_spill]] }
 0x41f   : > { %p20_p11 = scmp.ge.s32.totalorder %s1322_s11, 4   ;;  %s1588_s27 = smov %s1223_s28 }
 0x420   : > { %s1590_s30 = smov %s1322_s11 }
 0x421   :  { %22 = sbr.rel (!%p20_p11) target bundleno = 5 (0x5), region = 96 }
 0x424   : > { %s1589_s28 = smov %s1586_s22 }
 0x428   :  { %810 = vsyncpa [#allocation4], 1 }
 0x429   :  { %812 = vsyncpa [#allocation4 + $0x1], 1 }
 0x42a   :  { %813 = vsyncpa [#allocation7], 1 }
 0x42b   :  { %814 = vsyncpa [#allocation5], 1 }
 0x42c   :  { %816 = vsyncpa [#allocation5 + $0x1], 1 }

</bundles_post_ra>
